<compile_context>
chip_gen: v7x
topology: tpu7x:2x2x1
jax: 0.10.0
libtpu: 0.0.40
codegen_flags: <defaults>
</compile_context>

<pallas_src>
import functools

import jax
import jax.numpy as jnp
from jax import lax
from jax.experimental import pallas as pl
from jax.experimental.pallas import tpu as pltpu


def _tpu_vmem_bytes():
    """Best-effort VMEM capacity query (per-generation tile/limit selection)."""
    try:
        return int(pltpu.get_tpu_info().vmem_capacity_bytes)
    except Exception:
        return 64 * 1024 * 1024  # conservative (v7x-sized) fallback


def _residual_kernel(x_ref, w1_ref, w2_ref, o_ref, *, c_in, lane_pack):
    # x_ref : (ROWS, C_pad)   ROWS = nb * L_pad; each sequence occupies rows
    #                         [1, L] of its L_pad-row slot, rows 0 and L+1..
    #                         are zero guard rows (=> conv zero padding).
    # w1_ref: lane_pack -> (C_pad, C_res_pad)  taps packed along lanes (bf16)
    #         else      -> (3*C_pad, C_res_pad) tap-major rows (bf16)
    # w2_ref: (C_res_pad, C_pad)  1x1 conv weights (bf16)
    # o_ref : (ROWS, C_pad)
    rows, c_pad = x_ref.shape

    h = jnp.maximum(x_ref[...].astype(jnp.float32), 0.0)        # ReLU(x)

    # +/-1 sequence shifts via XLU sublane rolls.  Wrapped rows always land on
    # zero guard rows, so no boundary masks are needed.
    h_prev = pltpu.roll(h, shift=1, axis=0)
    h_next = pltpu.roll(h, shift=rows - 1, axis=0)               # roll by -1

    if lane_pack:
        # Lanes c_in..c_pad-1 of h are already zero (channel padding), so the
        # three taps can be packed side-by-side along lanes: one K=128 matmul
        # instead of K=3*128.
        hpack = (h
                 + pltpu.roll(h_prev, shift=c_in, axis=1)
                 + pltpu.roll(h_next, shift=2 * c_in, axis=1))
        y = jnp.dot(hpack.astype(jnp.bfloat16), w1_ref[...],
                    preferred_element_type=jnp.float32)
    else:
        w1 = w1_ref[...]
        y = jnp.dot(h_prev.astype(jnp.bfloat16), w1[0 * c_pad:1 * c_pad],
                    preferred_element_type=jnp.float32)
        y += jnp.dot(h.astype(jnp.bfloat16), w1[1 * c_pad:2 * c_pad],
                     preferred_element_type=jnp.float32)
        y += jnp.dot(h_next.astype(jnp.bfloat16), w1[2 * c_pad:3 * c_pad],
                     preferred_element_type=jnp.float32)

    y = jnp.maximum(y, 0.0)                                      # ReLU

    # 1x1 conv == channel matmul.
    z = jnp.dot(y.astype(jnp.bfloat16), w2_ref[...],
                preferred_element_type=jnp.float32)

    # Residual add: re-read x (don't keep it live across both matmuls).
    o_ref[...] = (x_ref[...].astype(jnp.float32) + z).astype(o_ref.dtype)


def residual_forward(x_ncl, w1_oik, w2_oik):
    """x_ncl: (N, C_in, L) like PyTorch.  Weights in PyTorch Conv1d layout:
       w1_oik: (C_res, C_in, 3),  w2_oik: (C_hid, C_res, 1)."""
    N, C_in, L = x_ncl.shape
    C_res = w1_oik.shape[0]
    C_hid = w2_oik.shape[0]
    assert C_hid == C_in, "residual add requires num_hiddens == in_channels"

    LANE, SUB = 128, 8
    C_pad = ((C_in + LANE - 1) // LANE) * LANE
    C_res_pad = ((C_res + LANE - 1) // LANE) * LANE
    # One zero guard row on each side of every sequence -> L_pad >= L + 2.
    L_pad = ((L + 2 + SUB - 1) // SUB) * SUB

    # Per-generation tile / VMEM-limit selection.
    big_vmem = _tpu_vmem_bytes() >= 96 * 1024 * 1024             # v5e/v6e: 128 MiB
    rows_target = 8192 if big_vmem else 4096
    vmem_limit = (64 if big_vmem else 32) * 1024 * 1024

    # Batch elements per grid step: large enough to amortize per-step overhead,
    # but capped so the grid has >= min(N, 4) steps (v7x megacore + pipelining).
    nb = max(1, rows_target // L_pad)
    nb = min(nb, N)
    nb = min(nb, max(1, -(-N // 4)))
    N_pad = ((N + nb - 1) // nb) * nb
    ROWS = nb * L_pad
    grid = N_pad // nb
    # TODO(synk): for very long sequences (L_pad > rows_target) this degrades to
    # one huge block per batch element; split L across grid steps with an 8-row
    # halo block instead of relying on a bigger VMEM limit.

    lane_pack = 3 * C_in <= C_pad

    # NCL -> NLC, embed with guard rows, pad channels to 128 lanes, flatten to
    # lane-dense rows.
    # TODO(synk): in a full model keep activations in (rows, channels) layout
    # end-to-end so these staging transposes/pads disappear; also consider
    # packing 4 narrow-channel batch elements side-by-side in lanes.
    x_nlc = jnp.transpose(x_ncl, (0, 2, 1))                      # (N, L, C_in)
    x_p = jnp.zeros((N_pad, L_pad, C_pad), x_ncl.dtype)
    x_p = x_p.at[:N, 1:L + 1, :C_in].set(x_nlc)
    x_rows = x_p.reshape(N_pad * L_pad, C_pad)

    # Conv weights (bf16 for the MXU; f32 accumulation in-kernel).
    w1_t = jnp.transpose(w1_oik, (2, 1, 0)).astype(jnp.bfloat16)  # (3, C_in, C_res)
    if lane_pack:
        # Lane-packed operand is [h | h_prev | h_next] along lanes, so rows of
        # the packed weight are [tap1 | tap0 | tap2].
        w1_p = jnp.zeros((C_pad, C_res_pad), jnp.bfloat16)
        w1_p = w1_p.at[0 * C_in:1 * C_in, :C_res].set(w1_t[1])
        w1_p = w1_p.at[1 * C_in:2 * C_in, :C_res].set(w1_t[0])
        w1_p = w1_p.at[2 * C_in:3 * C_in, :C_res].set(w1_t[2])
        w1_shape = (C_pad, C_res_pad)
    else:
        w1_3 = jnp.zeros((3, C_pad, C_res_pad), jnp.bfloat16)
        w1_3 = w1_3.at[:, :C_in, :C_res].set(w1_t)
        w1_p = w1_3.reshape(3 * C_pad, C_res_pad)
        w1_shape = (3 * C_pad, C_res_pad)

    w2_t = jnp.transpose(w2_oik[:, :, 0], (1, 0)).astype(jnp.bfloat16)  # (C_res, C_hid)
    w2_p = jnp.zeros((C_res_pad, C_pad), jnp.bfloat16)
    w2_p = w2_p.at[:C_res, :C_hid].set(w2_t)

    kernel = functools.partial(_residual_kernel, c_in=C_in, lane_pack=lane_pack)

    out_rows = pl.pallas_call(
        kernel,
        out_shape=jax.ShapeDtypeStruct((N_pad * L_pad, C_pad), x_ncl.dtype),
        grid_spec=pltpu.PrefetchScalarGridSpec(
            num_scalar_prefetch=0,
            grid=(grid,),
            in_specs=[
                pl.BlockSpec((ROWS, C_pad), lambda i: (i, 0)),
                pl.BlockSpec(w1_shape, lambda i: (0, 0)),        # resident weights
                pl.BlockSpec((C_res_pad, C_pad), lambda i: (0, 0)),
            ],
            out_specs=pl.BlockSpec((ROWS, C_pad), lambda i: (i, 0)),
        ),
        compiler_params=pltpu.CompilerParams(
            dimension_semantics=("parallel",),
            vmem_limit_bytes=vmem_limit),
    )(x_rows, w1_p, w2_p)

    out = out_rows.reshape(N_pad, L_pad, C_pad)[:N, 1:L + 1, :C_in]
    return jnp.transpose(out, (0, 2, 1))                         # back to NCL


def residual_reference(x_ncl, w1_oik, w2_oik):
    """Pure-JAX reference mirroring the PyTorch module exactly (NCL layout)."""
    h = jnp.maximum(x_ncl, 0.0)
    y = lax.conv_general_dilated(
        h, w1_oik, window_strides=(1,), padding=((1, 1),),
        dimension_numbers=("NCH", "OIH", "NCH"))
    y = jnp.maximum(y, 0.0)
    z = lax.conv_general_dilated(
        y, w2_oik, window_strides=(1,), padding=((0, 0),),
        dimension_numbers=("NCH", "OIH", "NCH"))
    return x_ncl + z


def _run_case(key, N, C_in, L, C_res, tol):
    kx, k1, k2 = jax.random.split(key, 3)
    x = jax.random.normal(kx, (N, C_in, L), dtype=jnp.float32)
    w1 = 0.1 * jax.random.normal(k1, (C_res, C_in, 3), dtype=jnp.float32)
    w2 = 0.1 * jax.random.normal(k2, (C_in, C_res, 1), dtype=jnp.float32)

    out = jax.block_until_ready(residual_forward(x, w1, w2))
    ref = residual_reference(x, w1, w2)
    assert out.shape == (N, C_in, L)
    # bf16 MXU operands (f32 accumulation) => slightly looser tolerance.
    assert jnp.allclose(out, ref, atol=tol, rtol=tol)


if __name__ == "__main__":
    key = jax.random.PRNGKey(0)
    k1, k2 = jax.random.split(key, 2)

    # Residual(in_channels=32, num_hiddens=32, num_residual_hiddens=16):
    # lane-packed single-matmul path (3*C_in <= 128).
    _run_case(k1, N=2, C_in=32, L=16, C_res=16, tol=3e-2)

    # Residual(64, 64, 48): 3-tap accumulated-dot fallback path, odd L to
    # exercise sequence/batch padding.
    _run_case(k2, N=3, C_in=64, L=21, C_res=48, tol=3e-2)

    print("KERNEL_OK")
</pallas_src>

<mosaic_0001>
module attributes {stable_mosaic.version = 11 : i64} {
  func.func @_residual_kernel(%arg0: i32, %arg1: memref<24x128xf32, #tpu.memory_space<vmem>>, %arg2: memref<128x128xbf16, #tpu.memory_space<vmem>>, %arg3: memref<128x128xbf16, #tpu.memory_space<vmem>>, %arg4: memref<24x128xf32, #tpu.memory_space<vmem>>) attributes {dimension_semantics = [#tpu.dimension_semantics<parallel>], iteration_bounds = array<i64: 2>, scalar_prefetch = 0 : i64, scratch_operands = 0 : i64, tpu.core_type = #tpu.core_type<tc>, window_params = [{transform_indices = @transform_0, window_bounds = array<i64: 24, 128>}, {pipeline_mode = #tpu.pipeline_mode<synchronous>, transform_indices = @transform_1, window_bounds = array<i64: 128, 128>}, {pipeline_mode = #tpu.pipeline_mode<synchronous>, transform_indices = @transform_2, window_bounds = array<i64: 128, 128>}, {transform_indices = @transform_3, window_bounds = array<i64: 24, 128>}]} {
    %c0 = arith.constant 0 : index
    %c0_0 = arith.constant 0 : index
    %0 = vector.load %arg1[%c0, %c0_0] : memref<24x128xf32, #tpu.memory_space<vmem>>, vector<24x128xf32>
    %cst = arith.constant 0.000000e+00 : f32
    %1 = vector.broadcast %cst : f32 to vector<24x128xf32>
    %2 = arith.maximumf %0, %1 : vector<24x128xf32>
    %c1_i32 = arith.constant 1 : i32
    %3 = tpu.dynamic_rotate %2 by %c1_i32 dim 0 : vector<24x128xf32>, i32 -> vector<24x128xf32>
    %c23_i32 = arith.constant 23 : i32
    %4 = tpu.dynamic_rotate %2 by %c23_i32 dim 0 : vector<24x128xf32>, i32 -> vector<24x128xf32>
    %c32_i32 = arith.constant 32 : i32
    %5 = tpu.dynamic_rotate %3 by %c32_i32 dim 1 : vector<24x128xf32>, i32 -> vector<24x128xf32>
    %6 = arith.addf %2, %5 : vector<24x128xf32>
    %c64_i32 = arith.constant 64 : i32
    %7 = tpu.dynamic_rotate %4 by %c64_i32 dim 1 : vector<24x128xf32>, i32 -> vector<24x128xf32>
    %8 = arith.addf %6, %7 : vector<24x128xf32>
    %9 = arith.truncf %8 : vector<24x128xf32> to vector<24x128xbf16>
    %c0_1 = arith.constant 0 : index
    %c0_2 = arith.constant 0 : index
    %10 = vector.load %arg2[%c0_1, %c0_2] : memref<128x128xbf16, #tpu.memory_space<vmem>>, vector<128x128xbf16>
    %cst_3 = arith.constant dense<0.000000e+00> : vector<24x128xf32>
    %11 = tpu.matmul %9, %10, %cst_3 {dimension_numbers = #tpu.dot_dimension_numbers<[1], [0], [0], [1], [0, 0, 1, 1], [], []>} : vector<24x128xbf16>, vector<128x128xbf16>, vector<24x128xf32> -> vector<24x128xf32>
    %cst_4 = arith.constant 0.000000e+00 : f32
    %12 = vector.broadcast %cst_4 : f32 to vector<24x128xf32>
    %13 = arith.maximumf %11, %12 : vector<24x128xf32>
    %14 = arith.truncf %13 : vector<24x128xf32> to vector<24x128xbf16>
    %c0_5 = arith.constant 0 : index
    %c0_6 = arith.constant 0 : index
    %15 = vector.load %arg3[%c0_5, %c0_6] : memref<128x128xbf16, #tpu.memory_space<vmem>>, vector<128x128xbf16>
    %cst_7 = arith.constant dense<0.000000e+00> : vector<24x128xf32>
    %16 = tpu.matmul %14, %15, %cst_7 {dimension_numbers = #tpu.dot_dimension_numbers<[1], [0], [0], [1], [0, 0, 1, 1], [], []>} : vector<24x128xbf16>, vector<128x128xbf16>, vector<24x128xf32> -> vector<24x128xf32>
    %c0_8 = arith.constant 0 : index
    %c0_9 = arith.constant 0 : index
    %17 = vector.load %arg1[%c0_8, %c0_9] : memref<24x128xf32, #tpu.memory_space<vmem>>, vector<24x128xf32>
    %18 = arith.addf %17, %16 : vector<24x128xf32>
    %c0_10 = arith.constant 0 : index
    %c0_11 = arith.constant 0 : index
    %19 = vector.load %arg4[%c0_10, %c0_11] : memref<24x128xf32, #tpu.memory_space<vmem>>, vector<24x128xf32>
    tpu.vector_store %arg4[%c0_10, %c0_11], %18 {strides = array<i32>} : memref<24x128xf32, #tpu.memory_space<vmem>>, vector<24x128xf32>,
    return
  }
  func.func @transform_0(%arg0: i32) -> (i32, i32) {
    %c0_i32 = arith.constant 0 : i32
    %c0_i32_0 = arith.constant 0 : i32
    return %arg0, %c0_i32 : i32, i32
  }
  func.func @transform_1(%arg0: i32) -> (i32, i32) {
    %c0_i32 = arith.constant 0 : i32
    %c0_i32_0 = arith.constant 0 : i32
    %c0_i32_1 = arith.constant 0 : i32
    return %c0_i32, %c0_i32_0 : i32, i32
  }
  func.func @transform_2(%arg0: i32) -> (i32, i32) {
    %c0_i32 = arith.constant 0 : i32
    %c0_i32_0 = arith.constant 0 : i32
    %c0_i32_1 = arith.constant 0 : i32
    return %c0_i32, %c0_i32_0 : i32, i32
  }
  func.func @transform_3(%arg0: i32) -> (i32, i32) {
    %c0_i32 = arith.constant 0 : i32
    %c0_i32_0 = arith.constant 0 : i32
    return %arg0, %c0_i32 : i32, i32
  }
}

</mosaic_0001>

<bundles_post_ra>
// kernel: tpu_custom_call.1
= control target key start
LH: loop header
LB: loop body
LE: loop exit
PB: predicated region body
PF: predicated region fallthrough
CT: control target
= control target key end

     0   :  { %8 = vsyncpa [#allocation3], 0  ;;  %s1248_s0 = inlined_call_operand.hbm [shape: f32[48,128], index: 0, kind: input, shape index: {}]   ;;  %s1249_s1 = inlined_call_operand.hbm [shape: bf16[128,128], index: 1, kind: input, shape index: {}]   ;;  %s1250_s2 = inlined_call_operand.hbm [shape: bf16[128,128], index: 2, kind: input, shape index: {}]   ;;  %s1251_s3 = inlined_call_operand.hbm [shape: f32[48,128], index: 3, kind: output, shape index: {}]  }
   0x1   :  { %10 = vsyncpa [#allocation3 + $0x1], 0 }
   0x2   :  { %11 = vsyncpa [#allocation6], 0 }
   0x3   :  { %12 = vsyncpa [#allocation4], 0 }
   0x4   :  { %14 = vsyncpa [#allocation4 + $0x1], 0  ;;  %s977_s12 = smov 0   ;;  %s979_s13 = smov 0  }
   0x5   :  { %s981_s14 = smov 0   ;;  %s983_s15 = smov 0  }
   0x6 LB: > { %s998_s16 = sadd.s32 4294967295, %s943_s15   ;;  %s604_s17 = sadd.s32 4294967294, %s943_s15   ;;  %s943_s15 = sphi %s983_s15, %s1271_s15   ;;  %s939_s14 = sphi %s981_s14, %s1270_s14   ;;  %s935_s13 = sphi %s979_s13, %s1269_s13   ;;  %s931_s12 = sphi %s977_s12, %s1268_s12  }
   0x7   : > { %p40_p0 = scmp.ne.s32.totalorder %s935_s13, %s931_s12  ;;  %p1252_p1 = scmp.eq.s32.totalorder %s998_s16, 0 }
   0x8   : > { %p112_p3 = scmp.eq.s32.totalorder %s604_s17, 1  ;;  %p605_p5 = scmp.ge.s32.totalorder %s943_s15, 1 }
   0x9   : > { %p1007_p4 = por %p1252_p1, %p40_p0  ;;  %p119_p7 = scmp.lt.s32.totalorder %s943_s15, 3 }
   0xa   : > { %p1012_p6 = por %p112_p3, %p40_p0  ;;  %s945_s21 = smov [#allocation5]  }
   0xb   : > { %s1255_s18 = scalar_select %p1007_p4, 1, 0 }
   0xc   : > { %s1256_s19 = scalar_select %p1012_p6, 1, 0 }
   0xd   : > { %p1017_p8 = pnand %p605_p5, %p119_p7  ;;  %s131_s22 = sshll.u32 %s945_s21, 4  ;;  %s1021_s22 = int_to_ptr.vmem [resolvable:$true] %s131_s22 }
   0xe   : > { %s946_s24 = smov [#allocation7]   ;;  %s787_s28 = scalar_lea.hbm %s1249_s1, 1024 }
   0xf   : > { %p708_p9 = pneg %p1017_p8  ;;  %s144_s25 = sshll.u32 %s946_s24, 4  ;;  %s1032_s25 = int_to_ptr.vmem [resolvable:$true] %s144_s25 }
  0x10   : > { %p788_p12 = scmp.ne.s32.totalorder %s1249_s1, %s787_s28  ;;  %p794_p5 = scmp.lt.u32.totalorder %s787_s28, %s1249_s1 }
  0x11   : > { %p1028_p11 = pnand %p708_p9, %p1252_p1 }
  0x13   : > { %p789_p13 = pneg %p1028_p11 }
  0x15   : > { %p790_p0 = pnand %p789_p13, %p788_p12 }
  0x17   : > { %p791_p3 = pneg %p790_p0 }
  0x19   : > { %p796_p7 = pnand %p794_p5, %p791_p3 }
  0x1b   : > { %799 = shalt.err (!%p796_p7)
}
  0x1c   : > { %s800_s6 = scalar_lea.vmem %s1021_s22, 1024  ;;  %p808_p2 = scmp.lt.s32.totalorder %s1021_s22, %s1021_s22 }
  0x1d   : > { %p801_p9 = scmp.ne.s32.totalorder %s1021_s22, %s800_s6  ;;  %p809_p12 = scmp.lt.s32.totalorder %s800_s6, %s800_s6 }
  0x1f   : > { %p803_p10 = pnand %p801_p9, %p789_p13  ;;  %p810_p0 = por %p809_p12, %p808_p2 }
  0x21   : > { %p804_p1 = pneg %p803_p10 }
  0x23   : > { %p811_p6 = pnand %p810_p0, %p804_p1 }
  0x25   : > { %814 = shalt.err (!%p811_p6)
}
  0x26   : > { %s947_s7 = smov 64   ;;  %s948_s8 = smov 4  }
  0x27   : > { %711 = dma.hbm_to_vmem [thread:$0]  (!%p1028_p11), %s1249_s1, 1024, %s1021_s22, [#allocation6], %s947_s7, %s947_s7, %s948_s8  }
  0x28   : > { %s815_s21 = scalar_lea.hbm %s1250_s2, 1024 }
  0x29   : > { %p816_p2 = scmp.ne.s32.totalorder %s1250_s2, %s815_s21  ;;  %p822_p10 = scmp.lt.u32.totalorder %s815_s21, %s1250_s2 }
  0x2b   : > { %p818_p1 = pnand %p816_p2, %p789_p13 }
  0x2d   : > { %p819_p6 = pneg %p818_p1 }
  0x2f   : > { %p824_p3 = pnand %p822_p10, %p819_p6 }
  0x31   : > { %827 = shalt.err (!%p824_p3)
}
  0x32   : > { %s828_s22 = scalar_lea.vmem %s1032_s25, 1024  ;;  %p836_p12 = scmp.lt.s32.totalorder %s1032_s25, %s1032_s25 }
  0x33   : > { %p829_p5 = scmp.ne.s32.totalorder %s1032_s25, %s828_s22  ;;  %p837_p0 = scmp.lt.s32.totalorder %s828_s22, %s828_s22 }
  0x35   : > { %p831_p7 = pnand %p829_p5, %p789_p13  ;;  %p838_p2 = por %p837_p0, %p836_p12 }
  0x37   : > { %p832_p9 = pneg %p831_p7 }
  0x39   : > { %p839_p1 = pnand %p838_p2, %p832_p9 }
  0x3b   : > { %842 = shalt.err (!%p839_p1)
}
  0x3c   : > { %714 = dma.hbm_to_vmem [thread:$0]  (!%p1028_p11), %s1250_s2, 1024, %s1032_s25, [#allocation6], %s947_s7, %s947_s7, %s948_s8  }
  0x3d   : > { %s1087_s4 = sadd.s32 1, %s943_s15   ;;  %s27_s23 = sadd.s32 1, %s939_s14 }
  0x3e   : > { %s24_s5 = ssub.s32 %s943_s15, %s1087_s4  ;;  %p34_p13 = scmp.ne.s32.totalorder %s939_s14, %s935_s13 }
  0x3f   : > { %p25_p6 = scmp.eq.s32.totalorder %s24_s5, 0  ;;  %p35_p10 = scmp.eq.s32.totalorder %s943_s15, 0 }
  0x40   : > { %p1259_p3 = scmp.eq.s32.totalorder %s998_s16, 1  ;;  %p725_p7 = scmp.lt.s32.totalorder %s943_s15, 2 }
  0x41   : > { %s1103_s9 = scalar_select %p25_p6, %s939_s14, %s27_s23  }
  0x42   : > { %p1097_p5 = por %p1259_p3, %p34_p13  ;;  %p36_p9 = por %p35_p10, %p34_p13 }
  0x43   : > { %s158_s10 = sand.u32 1, %s939_s14   ;;  %s632_s25 = smul.u32 384, %s943_s15 }
  0x44   : > { %s1260_s6 = scalar_select %p1097_p5, 1, 0 }
  0x45   : > { %s694_s11 = smul.u32 24, %s158_s10  ;;  %p1107_p11 = pnand %p725_p7, %p36_p9 }
  0x46   : > { %s1114_s21 = scalar_lea.hbm %s1248_s0, %s632_s25  ;;  %s1118_s27 = scalar_lea.sflag [#allocation3], %s158_s10 }
  0x47   : > { %s162_s24 = scalar_lea.vmem [#allocation2], %s694_s11  ;;  %s843_s28 = scalar_lea.hbm %s1114_s21, 384 }
  0x48   : > { %s169_s26 = sshll.u32 %s162_s24, 4  ;;  %p844_p12 = scmp.ne.s32.totalorder %s1114_s21, %s843_s28  ;;  %s1116_s26 = int_to_ptr.vmem [resolvable:$true] %s169_s26 }
  0x49   : > { %p845_p0 = pneg %p1107_p11  ;;  %s848_s30 = scalar_lea.hbm %s1248_s0, 768 }
  0x4a   : > { %p849_p13 = scmp.lt.u32.totalorder %s1114_s21, %s1248_s0  ;;  %p850_p6 = scmp.lt.u32.totalorder %s848_s30, %s843_s28 }
  0x4b   : > { %p846_p2 = pnand %p845_p0, %p844_p12  ;;  %p852_p3 = scmp.lt.u32.totalorder %s843_s28, %s1114_s21 }
  0x4c   : > { %p851_p10 = por %p850_p6, %p849_p13 }
  0x4d   : > { %p847_p1 = pneg %p846_p2 }
  0x4e   : > { %p853_p7 = por %p852_p3, %p851_p10 }
  0x50   : > { %p854_p9 = pnand %p853_p7, %p847_p1 }
  0x52   : > { %857 = shalt.err (!%p854_p9)
}
  0x53   : > { %s858_s10 = scalar_lea.vmem %s1116_s26, 384  ;;  %s949_s11 = smov [#allocation2]  }
  0x54   : > { %p859_p12 = scmp.ne.s32.totalorder %s1116_s26, %s858_s10  ;;  %s863_s25 = sshll.u32 %s949_s11, 4  ;;  %s864_s25 = int_to_ptr.vmem [resolvable:$false] %s863_s25 }
  0x55   : > { %s865_s8 = scalar_lea.vmem %s864_s25, 768  ;;  %p866_p4 = scmp.lt.s32.totalorder %s1116_s26, %s864_s25 }
  0x56   : > { %p861_p2 = pnand %p859_p12, %p845_p0  ;;  %p867_p13 = scmp.lt.s32.totalorder %s865_s8, %s858_s10 }
  0x58   : > { %p862_p5 = pneg %p861_p2  ;;  %p868_p6 = por %p867_p13, %p866_p4 }
  0x5a   : > { %p869_p10 = pnand %p868_p6, %p862_p5 }
  0x5c   : > { %872 = shalt.err (!%p869_p10)
}
  0x5d   : > { %s950_s17 = smov 128   ;;  %s951_s24 = smov 8  }
  0x5e   : > { %718 = dma.hbm_to_vmem [thread:$0]  (!%p1107_p11), %s1114_s21, 384, %s1116_s26, %s1118_s27, %s950_s17, %s950_s17, %s951_s24  }
  0x5f   : > { %181 = sbr.rel (%p1017_p8) target bundleno = 692 (0x2b4), region = 32  ;;  %s1149_s28 = sand.u32 (!%p1017_p8), 1, %s935_s13  }
  0x60   : > { %s695_s22 = smul.u32 (!%p1017_p8), 24, %s1149_s28  ;;  %s184_s29 = scalar_lea.sflag (!%p1017_p8), [#allocation3], %s1149_s28 }
  0x61   : > { %p1262_p4 = scmp.ne.s32.totalorder (!%p1017_p8), %s1255_s18, 0 }
  0x62   : > { %s187_s30 = scalar_lea.vmem (!%p1017_p8), [#allocation2], %s695_s22 }
  0x66   : > { %918 = dma.done.wait (%p1262_p4), %s184_s29, 384  }
  0x67   : > { %920 = vsyncadd (%p1262_p4), %s184_s29, 4294966912  ;;  %p1263_p5 = scmp.eq.s32.totalorder %s998_s16, 0 }
  0x69   : > { %922 = dma.done.wait (%p1263_p5), [#allocation6], 2048   ;;  %p1264_p8 = pmov %p1263_p5 }
  0x6a   : > { %v230_v0 = vlaneseq  ;;  %v1163_v2 = vld [vmem:[%s187_s30 + $0x8] sm:$0xff]  ;;  %v1165_v3 = vld [vmem:[%s187_s30 + $0x10] sm:$0xff]  ;;  %v1167_v4 = vld [vmem:[%s187_s30] sm:$0xff]  ;;  %s952_s18 = smov 32   ;;  %s953_s20 = smov 64  }
  0x6b   : > { %924 = vsyncadd (%p1264_p8), [#allocation6], 4294965248  ;;  %v1170_v5 = vmax.f32 %v1163_v2, 0.0  ;;  %v1173_v6 = vmax.f32 %v1165_v3, 0.0  ;;  %v1176_v7 = vmax.f32 %v1167_v4, 0.0  ;;  %v771_v8 = vld [vmem:[#allocation5] sm:$0xff]  }
  0x6c   : > { %v231_v1 = vshrl.u32 %v230_v0, 7  ;;  %654 = vmatprep.subr.bf16.mxu0 %v771_v8  ;;  %v772_v13 = vld [vmem:[#allocation5 + $0x8] sm:$0xff]   ;;  %v773_v17 = vld [vmem:[#allocation5 + $0x10] sm:$0xff]   ;;  %v774_v21 = vld [vmem:[#allocation5 + $0x18] sm:$0xff]   ;;  %s217_s7 = scalar_lea.vmem [#allocation8], %s695_s22  ;;  %s633_s26 = smul.u32 384, %s998_s16 }
  0x6d   : > { %v228_v9 = vrot.slane %v1170_v5, 7  ;;  %v229_v10 = vrot.slane %v1173_v6, 7  ;;  %v227_v11 = vrot.slane %v1176_v7, 7  ;;  %v236_v12 = vrot.slane %v1176_v7, 1  ;;  %655 = vmatpush3.bf16.msra.mxu0 %v771_v8  ;;  %v779_v22 = vld [vmem:[#allocation7] sm:$0xff]   ;;  %v780_v25 = vld [vmem:[#allocation7 + $0x8] sm:$0xff]  }
  0x6e   : > { %vm232_vm0 = vcmp.lt.s32.totalorder %v231_v1, 1  ;;  %v237_v14 = vrot.slane %v1170_v5, 1  ;;  %vm239_vm1 = vcmp.lt.s32.totalorder %v231_v1, 7  ;;  %656 = vmatprep.subr.bf16.mxu0 %v772_v13  ;;  %v238_v20 = vrot.slane %v1173_v6, 1  ;;  %674 = vmatprep.subr.bf16.mxu1 %v779_v22  ;;  %v775_v26 = vld [vmem:[#allocation5 + $0x20] sm:$0xff]   ;;  %v781_v27 = vld [vmem:[#allocation7 + $0x10] sm:$0xff]   ;;  %s1203_s5 = scalar_lea.hbm %s1251_s3, %s633_s26 }
  0x6f   : > { %v233_v15 = vsel %vm232_vm0, %v228_v9, %v229_v10  ;;  %v235_v16 = vsel %vm232_vm0, %v229_v10, %v227_v11  ;;  %v234_v19 = vsel %vm232_vm0, %v227_v11, %v228_v9  ;;  %675 = vmatpush3.bf16.msra.mxu1 %v779_v22  ;;  %v776_v28 = vld [vmem:[#allocation5 + $0x28] sm:$0xff]   ;;  %v782_v29 = vld [vmem:[#allocation7 + $0x18] sm:$0xff]   ;;  %v777_v30 = vld [vmem:[#allocation5 + $0x30] sm:$0xff]   ;;  %s512_s21 = sshll.u32 %s217_s7, 4  ;;  %s499_s16 = scalar_lea.sflag [#allocation4], %s1149_s28  ;;  %s1197_s21 = int_to_ptr.vmem [resolvable:$true] %s512_s21 }
  0x70   : > { %247 = vrot.lane.b32.xlu1 %v233_v15, %s952_s18  ;;  %243 = vrot.lane.b32.xlu0 %v235_v16, %s952_s18  ;;  %v241_v18 = vsel %vm239_vm1, %v236_v12, %v237_v14  ;;  %v242_v23 = vsel %vm239_vm1, %v238_v20, %v236_v12  ;;  %v240_v24 = vsel %vm239_vm1, %v237_v14, %v238_v20  ;;  %v783_v31 = vld [vmem:[#allocation7 + $0x20] sm:$0xff]   ;;  %v778_v32 = vld [vmem:[#allocation5 + $0x38] sm:$0xff]   ;;  %v784_v33 = vld [vmem:[#allocation7 + $0x28] sm:$0xff]   ;;  %s873_s10 = scalar_lea.vmem %s1197_s21, 384  ;;  %p1265_p0 = scmp.ne.s32.totalorder %s1260_s6, 0 }
  0x71   : > { %657 = vmatpush3.bf16.msra.mxu0 %v772_v13  ;;  %676 = vmatprep.subr.bf16.mxu1 %v780_v25  ;;  %v785_v48 = vld [vmem:[#allocation7 + $0x30] sm:$0xff]   ;;  %v786_v49 = vld [vmem:[#allocation7 + $0x38] sm:$0xff]   ;;  %p874_p11 = scmp.ne.s32.totalorder %s1197_s21, %s873_s10  ;;  %s954_s11 = smov [#allocation8]  }
  0x72   : > { %658 = vmatprep.subr.bf16.mxu0 %v773_v17  ;;  %s877_s25 = sshll.u32 %s954_s11, 4  ;;  %s878_s25 = int_to_ptr.vmem [resolvable:$false] %s877_s25 }
  0x73   : > { %677 = vmatpush3.bf16.msra.mxu1 %v780_v25  ;;  %p875_p1 = pnand %p874_p11, %p1265_p0  ;;  %s879_s8 = scalar_lea.vmem %s878_s25, 768 }
  0x74   : > { %252 = vrot.lane.b32.xlu1 %v241_v18, %s953_s20  ;;  %245 = vrot.lane.b32.xlu0 %v234_v19, %s952_s18  ;;  %p880_p7 = scmp.lt.s32.totalorder %s1197_s21, %s878_s25  ;;  %p881_p9 = scmp.lt.s32.totalorder %s879_s8, %s873_s10 }
  0x75   : > { %659 = vmatpush3.bf16.msra.mxu0 %v773_v17  ;;  %678 = vmatprep.subr.bf16.mxu1 %v781_v27  ;;  %p876_p3 = pneg %p875_p1 }
  0x76   : > { %660 = vmatprep.subr.bf16.mxu0 %v774_v21  ;;  %p882_p12 = por %p881_p9, %p880_p7 }
  0x77   : > { %679 = vmatpush3.bf16.msra.mxu1 %v781_v27 }
  0x78   : > { %256 = vrot.lane.b32.xlu1 %v242_v23, %s953_s20  ;;  %254 = vrot.lane.b32.xlu0 %v240_v24, %s953_s20  ;;  %p883_p2 = pnand %p882_p12, %p876_p3 }
  0x79   : > { %661 = vmatpush3.bf16.msra.mxu0 %v774_v21  ;;  %680 = vmatprep.subr.bf16.mxu1 %v782_v29 }
  0x7a   : > { %662 = vmatprep.subr.bf16.mxu0 %v775_v26 }
  0x7b   : > { %681 = vmatpush3.bf16.msra.mxu1 %v782_v29 }
  0x7c   : > { %682 = vmatprep.subr.bf16.mxu1 %v783_v31 }
  0x7d   : > { %663 = vmatpush3.bf16.msra.mxu0 %v775_v26 }
  0x7e   : > { %664 = vmatprep.subr.bf16.mxu0 %v776_v28 }
  0x7f   : > { %683 = vmatpush3.bf16.msra.mxu1 %v783_v31 }
  0x80   : > { %684 = vmatprep.subr.bf16.mxu1 %v784_v33 }
  0x81   : > { %665 = vmatpush3.bf16.msra.mxu0 %v776_v28 }
  0x82   : > { %666 = vmatprep.subr.bf16.mxu0 %v777_v30 }
  0x83   : > { %685 = vmatpush3.bf16.msra.mxu1 %v784_v33 }
  0x84   : > { %686 = vmatprep.subr.bf16.mxu1 %v785_v48 }
  0x85   : > { %667 = vmatpush3.bf16.msra.mxu0 %v777_v30 }
  0x86   : > { %668 = vmatprep.subr.bf16.mxu0 %v778_v32 }
  0x87   : > { %687 = vmatpush3.bf16.msra.mxu1 %v785_v48 }
  0x88   : > { %688 = vmatprep.subr.bf16.mxu1 %v786_v49 }
  0x89   : > { %669 = vmatpush3.bf16.msra.mxu0 %v778_v32 }
  0x8b   : > { %689 = vmatpush3.bf16.msra.mxu1 %v786_v49 }
  0xe2   : > { %v248_v34 = vpop.permute.xlu1 %247  ;;  %v244_v35 = vpop.permute.xlu0 %243 }
  0xe3   : > { %v251_v38 = vadd.f32 %v248_v34, %v1173_v6  ;;  %v249_v39 = vadd.f32 %v244_v35, %v1176_v7 }
  0xe6   : > { %v253_v36 = vpop.permute.xlu1 %252  ;;  %v246_v37 = vpop.permute.xlu0 %245 }
  0xe7   : > { %v250_v40 = vadd.f32 %v246_v37, %v1170_v5  ;;  %v258_v43 = vadd.f32 %v253_v36, %v249_v39 }
  0xea   : > { %v257_v41 = vpop.permute.xlu1 %256  ;;  %v255_v42 = vpop.permute.xlu0 %254 }
  0xeb   : > { %v260_v44 = vadd.f32 %v257_v41, %v251_v38  ;;  %v259_v45 = vadd.f32 %v255_v42, %v250_v40 }
  0xed   : > { %v262_v46 = vpack.c.bf16 %v260_v44, %v260_v44  ;;  %v261_v47 = vpack.c.bf16 %v259_v45, %v258_v43 }
  0xef   : > { %670 = vmatprep.mubr.bf16.mxu0 %v261_v47 }
  0xf0   : > { %671 = vmatmul.mubr.bf16.vlgmr.msra.gmra.mrb[0].mxu0 %v262_v46 }
 0x1c3   : > { %v672_v50 = vpop.f32.mrb[0].mxu0 }
 0x1c4   : > { %v361_v51 = vpop.f32.mrb[1].mxu0  ;;  %v377_v53 = vmax.f32 %v672_v50, 0.0 }
 0x1c5   : > { %v673_v52 = vpop.f32.mrb[2].mxu0  ;;  %v375_v55 = vmax.f32 %v361_v51, 0.0 }
 0x1c6   : > { %v364_v54 = vpop.f32.mrb[3].mxu0  ;;  %v379_v58 = vpack.c.bf16 %v377_v53, %v377_v53 }
 0x1c7   : > { %v376_v56 = vmax.f32 %v364_v54, 0.0 }
 0x1c9   : > { %v378_v57 = vpack.c.bf16 %v376_v56, %v375_v55 }
 0x1cb   : > { %690 = vmatprep.mubr.bf16.mxu1 %v378_v57 }
 0x1cc   : > { %691 = vmatmul.mubr.bf16.vlgmr.msra.gmra.mrb[0].mxu1 %v379_v58 }
 0x29f   : > { %v692_v59 = vpop.f32.mrb[0].mxu1 }
 0x2a0   : > { %v494_v60 = vadd.f32 %v692_v59, %v1165_v3  ;;  %v478_v61 = vpop.f32.mrb[1].mxu1 }
 0x2a1   : > { %v492_v62 = vadd.f32 %v478_v61, %v1167_v4  ;;  %v693_v63 = vpop.f32.mrb[2].mxu1 }
 0x2a2   : > { %497 = vst [vmem:[%s217_s7 + $0x10] sm:$0xff] %v494_v60  ;;  %v481_v0 = vpop.f32.mrb[3].mxu1 }
 0x2a3   : > { %495 = vst [vmem:[%s217_s7] sm:$0xff] %v492_v62  ;;  %v493_v1 = vadd.f32 %v481_v0, %v1163_v2 }
 0x2a5   : > { %496 = vst [vmem:[%s217_s7 + $0x8] sm:$0xff] %v493_v1 }
 0x2a6   : > { %886 = shalt.err (!%p883_p2)
}
 0x2a7   : > { %s887_s17 = scalar_lea.hbm %s1203_s5, 384  ;;  %s891_s29 = scalar_lea.hbm %s1251_s3, 768 }
 0x2a8   : > { %p888_p13 = scmp.ne.s32.totalorder %s1203_s5, %s887_s17  ;;  %p892_p4 = scmp.lt.u32.totalorder %s1203_s5, %s1251_s3 }
 0x2a9   : > { %p893_p5 = scmp.lt.u32.totalorder %s891_s29, %s887_s17  ;;  %p895_p11 = scmp.lt.u32.totalorder %s887_s17, %s1203_s5 }
 0x2aa   : > { %p889_p6 = pnand %p888_p13, %p1265_p0 }
 0x2ab   : > { %p894_p8 = por %p893_p5, %p892_p4 }
 0x2ac   : > { %p890_p10 = pneg %p889_p6 }
 0x2ad   : > { %p896_p1 = por %p895_p11, %p894_p8 }
 0x2af   : > { %p897_p3 = pnand %p896_p1, %p890_p10 }
 0x2b1   : > { %900 = shalt.err (!%p897_p3)
}
 0x2b2   : > { %s955_s20 = smov 128   ;;  %s956_s7 = smov 8  }
 0x2b3   : > { %706 = dma.vmem_to_hbm [thread:$0]  (%p1265_p0), %s1197_s21, 384, %s1203_s5, %s499_s16, %s955_s20, %s955_s20, %s956_s7  }
 0x2b4 PF: > { %s527_s26 = sand.u32 1, %s931_s12   ;;  %p1266_p7 = scmp.ne.s32.totalorder %s1256_s19, 0 }
 0x2b5   : > { %p1267_p9 = scmp.ge.s32.totalorder %s943_s15, 2  ;;  %s528_s27 = scalar_lea.sflag [#allocation4], %s527_s26 }
 0x2b7   : > { %p720_p12 = pnand %p1267_p9, %p1266_p7 }
 0x2b9   : > { %926 = dma.done.wait (!%p720_p12), %s528_s27, 384  }
 0x2ba   : > { %928 = vsyncadd (!%p720_p12), %s528_s27, 4294966912  ;;  %p17_p2 = scmp.ge.s32.totalorder %s1087_s4, 4   ;;  %s1268_s12 = smov %s935_s13 }
 0x2bb   : > { %s1269_s13 = smov %s939_s14  ;;  %s1270_s14 = smov %s1103_s9 }
 0x2bc   : > { %s1271_s15 = smov %s1087_s4  ;;  %19 = sbr.rel (!%p17_p2) target bundleno = 6 (0x6), region = 85 }
 0x2c3   :  { %533 = vsyncpa [#allocation3], 1 }
 0x2c4   :  { %535 = vsyncpa [#allocation3 + $0x1], 1 }
 0x2c5   :  { %536 = vsyncpa [#allocation6], 1 }
 0x2c6   :  { %537 = vsyncpa [#allocation4], 1 }
 0x2c7   :  { %539 = vsyncpa [#allocation4 + $0x1], 1 }

</bundles_post_ra>
